<compile_context>
chip_gen: v6e
topology: v6e:2x2x1
jax: 0.10.0
libtpu: 0.0.40
codegen_flags: <defaults>
</compile_context>

<pallas_src>
import functools

import jax
import jax.numpy as jnp
from jax.experimental import pallas as pl
from jax.experimental.pallas import tpu as pltpu

_LANE = 128
_TARGET_BLOCK_BYTES = 4 * 1024 * 1024   # ~4 MiB per streamed block
_VMEM_LIMIT_BYTES = 48 * 1024 * 1024    # explicit: v5e's scoped default is 16 MiB


def _sublane_quantum(dtype):
    """Sublane multiple for a tiled block of this dtype (f32->8, bf16->16)."""
    itemsize = jnp.dtype(dtype).itemsize
    return max(8, 32 // max(itemsize, 1))


def _round_up(n, m):
    return ((n + m - 1) // m) * m


def _choose_tile_rows(rows, dtype):
    """Row tile: ~4 MiB blocks, sublane-aligned, and >=2 blocks when possible
    so both v7x TensorCores get work through the 'parallel' grid axis."""
    itemsize = jnp.dtype(dtype).itemsize
    quantum = _sublane_quantum(dtype)
    max_tile_r = max(
        quantum,
        (_TARGET_BLOCK_BYTES // (_LANE * itemsize)) // quantum * quantum)
    half = _round_up(pl.cdiv(rows, 2), quantum)
    return min(max_tile_r, half)


# --------------------------- kernels ---------------------------------------


def _rrelu_train_prng_kernel(seed_ref, x_ref, o_ref, *, c0, c1):
    """Train-mode RReLU using the in-kernel hardware PRNG (TPU only)."""
    # Mix (user seed, block index) so each grid block gets a distinct stream.
    pltpu.prng_seed(seed_ref[0], pl.program_id(0))
    bits = pltpu.prng_random_bits(x_ref.shape)
    ub = pltpu.bitcast(bits, jnp.uint32)
    # 23 random mantissa bits, exponent forced to 127 -> v uniform in [1, 2).
    fbits = (ub >> jnp.uint32(9)) | jnp.uint32(0x3F800000)
    v = pltpu.bitcast(fbits, jnp.float32)
    # a = lower + (upper-lower)*(v-1) == c0 + c1*v   (the "-1" is folded in)
    a = c0 + c1 * v
    x = x_ref[...]
    # Product in f32, single cast back: keeps slope resolution for bf16 x.
    o_ref[...] = jnp.where(x >= 0, x, (a * x.astype(jnp.float32)).astype(x.dtype))


def _rrelu_train_precomp_kernel(x_ref, a_ref, o_ref):
    """Train-mode RReLU with precomputed per-element slopes (portable path)."""
    x = x_ref[...]
    o_ref[...] = jnp.where(
        x >= 0, x, (a_ref[...] * x.astype(jnp.float32)).astype(x.dtype))


def _rrelu_eval_kernel(x_ref, o_ref, *, slope):
    x = x_ref[...]
    # `slope` is a weakly-typed Python float -> stays in x's dtype (bf16-safe).
    o_ref[...] = jnp.where(x >= 0, x, slope * x)


# --------------------------- wrapper ----------------------------------------


def rrelu(x, lower=1.0 / 8, upper=1.0 / 3, training=True, seed=0,
          donate_input=False):
    """Pallas RReLU. Elementwise; accepts any shape/dtype."""
    orig_shape = x.shape
    dtype = x.dtype
    total = x.size
    if total == 0:
        return x
    itemsize = jnp.dtype(dtype).itemsize

    if total % _LANE == 0:
        # Lane-aligned: contiguous reshape is free. A ragged trailing
        # row-block (rows not a multiple of the sublane quantum) is handled by
        # Pallas partial-block masking -> no pad/slice HBM round trip.
        rows = total // _LANE
        x2 = x.reshape(rows, _LANE)
        padded = False
    else:
        # Only truly ragged sizes (not 128-aligned) pay the pad + slice path.
        rows = pl.cdiv(total, _LANE)
        x2 = jnp.pad(x.reshape(-1), (0, rows * _LANE - total)).reshape(rows, _LANE)
        padded = True

    tile_r = _choose_tile_rows(rows, dtype)
    num_blocks = pl.cdiv(rows, tile_r)
    grid = (num_blocks,)
    block_bytes = tile_r * _LANE * itemsize

    # Triple-buffer the streamed input once blocks are big enough for the
    # third buffer to hide DMA-issue/writeback jitter (peak <= ~20 MiB VMEM).
    buf_kw = (dict(pipeline_mode=pl.Buffered(3))
              if (block_bytes >= _TARGET_BLOCK_BYTES and num_blocks >= 3)
              else {})

    out_sds = jax.ShapeDtypeStruct((rows, _LANE), dtype)
    cparams = pltpu.CompilerParams(
        dimension_semantics=("parallel",),
        vmem_limit_bytes=_VMEM_LIMIT_BYTES,
    )
    cost = pl.CostEstimate(flops=2 * total, transcendentals=0,
                           bytes_accessed=2 * total * itemsize)

    if not training:
        slope = (float(lower) + float(upper)) / 2.0
        out2 = pl.pallas_call(
            functools.partial(_rrelu_eval_kernel, slope=slope),
            out_shape=out_sds,
            grid=grid,
            in_specs=[pl.BlockSpec((tile_r, _LANE), lambda i: (i, 0), **buf_kw)],
            out_specs=pl.BlockSpec((tile_r, _LANE), lambda i: (i, 0)),
            compiler_params=cparams,
            cost_estimate=cost,
            input_output_aliases={0: 0} if donate_input else {},
        )(x2)
    elif jax.default_backend() == "tpu":
        c1 = float(upper) - float(lower)
        c0 = float(lower) - c1
        out2 = pl.pallas_call(
            functools.partial(_rrelu_train_prng_kernel, c0=c0, c1=c1),
            out_shape=out_sds,
            grid_spec=pltpu.PrefetchScalarGridSpec(
                num_scalar_prefetch=1,
                grid=grid,
                in_specs=[pl.BlockSpec((tile_r, _LANE), lambda i, s: (i, 0),
                                       **buf_kw)],
                out_specs=pl.BlockSpec((tile_r, _LANE), lambda i, s: (i, 0)),
            ),
            compiler_params=cparams,
            cost_estimate=cost,
            input_output_aliases={1: 0} if donate_input else {},
        )(jnp.asarray([seed], dtype=jnp.int32), x2)
    else:
        # Non-TPU backend (e.g. interpret/CPU): the TPU hardware PRNG has no
        # lowering there, so stream precomputed per-element slopes instead.
        a = jax.random.uniform(
            jax.random.PRNGKey(seed), (rows, _LANE), jnp.float32,
            minval=float(lower), maxval=float(upper))
        out2 = pl.pallas_call(
            _rrelu_train_precomp_kernel,
            out_shape=out_sds,
            grid=grid,
            in_specs=[pl.BlockSpec((tile_r, _LANE), lambda i: (i, 0), **buf_kw),
                      pl.BlockSpec((tile_r, _LANE), lambda i: (i, 0), **buf_kw)],
            out_specs=pl.BlockSpec((tile_r, _LANE), lambda i: (i, 0)),
            compiler_params=cparams,
            cost_estimate=cost,
            input_output_aliases={0: 0} if donate_input else {},
        )(x2, a)

    if padded:
        return out2.reshape(-1)[:total].reshape(orig_shape)
    return out2.reshape(orig_shape)


# ------------------------------ tests ----------------------------------------


if __name__ == "__main__":
    # RReLU has no learnable parameters; only (lower, upper) hyperparameters.
    lower, upper = 1.0 / 8, 1.0 / 3
    slope_eval = (lower + upper) / 2.0
    key = jax.random.PRNGKey(0)

    def check(x, seed):
        y_tr = jax.block_until_ready(rrelu(x, lower, upper, training=True, seed=seed))
        y_ev = jax.block_until_ready(rrelu(x, lower, upper, training=False))
        assert y_tr.shape == x.shape and y_ev.shape == x.shape
        assert y_tr.dtype == x.dtype and y_ev.dtype == x.dtype

        xf = x.astype(jnp.float32)
        yt = y_tr.astype(jnp.float32)
        ye = y_ev.astype(jnp.float32)
        is_f32 = x.dtype == jnp.float32

        # Eval mode matches the closed-form reference.
        ref = jnp.where(xf >= 0, xf, slope_eval * xf)
        rtol = 1e-6 if is_f32 else 1e-2
        atol = 1e-6 if is_f32 else 1e-2
        assert bool(jnp.allclose(ye, ref, rtol=rtol, atol=atol))

        # Positive values pass through unchanged in both modes.
        pos = xf >= 0
        assert bool(jnp.all(jnp.where(pos, y_tr == x, True)))
        assert bool(jnp.all(jnp.where(pos, y_ev == x, True)))

        # Training mode: negative outputs lie in [upper*x, lower*x] (x < 0).
        neg = xf < 0
        eps = (1e-6 if is_f32 else 1e-2) * jnp.abs(xf) + 1e-6
        ok = jnp.where(neg, (yt >= upper * xf - eps) & (yt <= lower * xf + eps), True)
        assert bool(jnp.all(ok))

    k1, k2, k3, k4 = jax.random.split(key, 4)

    # 1) Small NCHW f32 (primary example shape).
    check(jax.random.normal(k1, (2, 4, 16, 16), dtype=jnp.float32), seed=42)

    # 2) bf16, 128-aligned but NOT sublane-quantum-aligned (rows=24, quantum=16)
    #    -> exercises the relaxed fast path with a ragged trailing row-block.
    check(jax.random.normal(k2, (3, 8, 128), dtype=jnp.bfloat16), seed=7)

    # 3) Not 128-aligned -> pad + slice fallback path.
    check(jax.random.normal(k3, (2, 7, 5), dtype=jnp.float32), seed=3)

    # 4) Large f32: 4 MiB blocks, grid=3, Buffered(3) inputs, both-TC split.
    check(jax.random.normal(k4, (3, 64, 128, 128), dtype=jnp.float32), seed=11)

    print("KERNEL_OK")
</pallas_src>

<mosaic_0001>
module attributes {stable_mosaic.version = 11 : i64} {
  func.func @_rrelu_train_precomp_kernel(%arg0: i32, %arg1: memref<8x128xf32, #tpu.memory_space<vmem>>, %arg2: memref<8x128xf32, #tpu.memory_space<vmem>>, %arg3: memref<8x128xf32, #tpu.memory_space<vmem>>) attributes {dimension_semantics = [#tpu.dimension_semantics<parallel>], iteration_bounds = array<i64: 2>, scalar_prefetch = 0 : i64, scratch_operands = 0 : i64, tpu.core_type = #tpu.core_type<tc>, window_params = [{transform_indices = @transform_0, window_bounds = array<i64: 8, 128>}, {transform_indices = @transform_1, window_bounds = array<i64: 8, 128>}, {transform_indices = @transform_2, window_bounds = array<i64: 8, 128>}]} {
    %c0 = arith.constant 0 : index
    %c0_0 = arith.constant 0 : index
    %0 = vector.load %arg1[%c0, %c0_0] : memref<8x128xf32, #tpu.memory_space<vmem>>, vector<8x128xf32>
    %cst = arith.constant 0.000000e+00 : f32
    %1 = vector.broadcast %cst : f32 to vector<8x128xf32>
    %2 = arith.cmpf oge, %0, %1 : vector<8x128xf32>
    %c0_1 = arith.constant 0 : index
    %c0_2 = arith.constant 0 : index
    %3 = vector.load %arg2[%c0_1, %c0_2] : memref<8x128xf32, #tpu.memory_space<vmem>>, vector<8x128xf32>
    %4 = arith.mulf %3, %0 : vector<8x128xf32>
    %5 = arith.select %2, %0, %4 : vector<8x128xi1>, vector<8x128xf32>
    %c0_3 = arith.constant 0 : index
    %c0_4 = arith.constant 0 : index
    %6 = vector.load %arg3[%c0_3, %c0_4] : memref<8x128xf32, #tpu.memory_space<vmem>>, vector<8x128xf32>
    tpu.vector_store %arg3[%c0_3, %c0_4], %5 {strides = array<i32>} : memref<8x128xf32, #tpu.memory_space<vmem>>, vector<8x128xf32>,
    return
  }
  func.func @transform_0(%arg0: i32) -> (i32, i32) {
    %c0_i32 = arith.constant 0 : i32
    %c0_i32_0 = arith.constant 0 : i32
    return %arg0, %c0_i32 : i32, i32
  }
  func.func @transform_1(%arg0: i32) -> (i32, i32) {
    %c0_i32 = arith.constant 0 : i32
    %c0_i32_0 = arith.constant 0 : i32
    return %arg0, %c0_i32 : i32, i32
  }
  func.func @transform_2(%arg0: i32) -> (i32, i32) {
    %c0_i32 = arith.constant 0 : i32
    %c0_i32_0 = arith.constant 0 : i32
    return %arg0, %c0_i32 : i32, i32
  }
}

</mosaic_0001>

<bundles_post_ra>
// kernel: tpu_custom_call.1
= control target key start
LH: loop header
LB: loop body
LE: loop exit
PB: predicated region body
PF: predicated region fallthrough
CT: control target
= control target key end

     0   :  { %7 = vsyncpa [#allocation3], 0  ;;  %s719_s0 = inlined_call_operand.hbm [shape: f32[16,128], index: 0, kind: input, shape index: {}]   ;;  %s720_s1 = inlined_call_operand.hbm [shape: f32[16,128], index: 1, kind: input, shape index: {}]   ;;  %s721_s2 = inlined_call_operand.hbm [shape: f32[16,128], index: 2, kind: output, shape index: {}]  }
   0x1   :  { %9 = vsyncpa [#allocation3 + $0x1], 0 }
   0x2   :  { %10 = vsyncpa [#allocation6], 0 }
   0x3   :  { %12 = vsyncpa [#allocation6 + $0x1], 0 }
   0x4   :  { %13 = vsyncpa [#allocation4], 0 }
   0x5   :  { %15 = vsyncpa [#allocation4 + $0x1], 0  ;;  %s519_s9 = smov 0   ;;  %s521_s10 = smov 0  }
   0x6   :  { %s523_s11 = smov 0   ;;  %s525_s12 = smov 0  }
   0x7 LB: > { %s540_s13 = sadd.s32 4294967295, %s499_s12   ;;  %s309_s14 = sadd.s32 4294967294, %s499_s12   ;;  %s499_s12 = sphi %s525_s12, %s740_s12   ;;  %s495_s11 = sphi %s523_s11, %s739_s11   ;;  %s491_s10 = sphi %s521_s10, %s738_s10   ;;  %s487_s9 = sphi %s519_s9, %s737_s9  }
   0x8   : > { %s544_s15 = sadd.s32 1, %s499_s12   ;;  %s28_s16 = sadd.s32 1, %s495_s11 }
   0x9   : > { %s25_s17 = ssub.s32 %s499_s12, %s544_s15  ;;  %p35_p0 = scmp.ne.s32.totalorder %s495_s11, %s491_s10 }
   0xa   : > { %p26_p1 = scmp.eq.s32.totalorder %s25_s17, 0  ;;  %p36_p2 = scmp.eq.s32.totalorder %s499_s12, 0 }
   0xb   : > { %p41_p3 = scmp.ne.s32.totalorder %s491_s10, %s487_s9  ;;  %p42_p4 = scmp.eq.s32.totalorder %s540_s13, 0 }
   0xc   : > { %s556_s18 = scalar_select %p26_p1, %s495_s11, %s28_s16  }
   0xd   : > { %p558_p5 = por %p36_p2, %p35_p0  ;;  %p562_p6 = por %p42_p4, %p41_p3 }
   0xe   : > { %p91_p7 = scmp.eq.s32.totalorder %s540_s13, 1  ;;  %p97_p8 = scmp.eq.s32.totalorder %s309_s14, 1 }
   0xf   : > { %s725_s20 = scalar_select %p562_p6, 1, 0 }
  0x10   : > { %p341_p10 = scmp.lt.s32.totalorder %s499_s12, 2  ;;  %p569_p11 = por %p91_p7, %p35_p0 }
  0x11   : > { %p573_p12 = por %p97_p8, %p41_p3  ;;  %s578_s23 = sand.u32 1, %s495_s11  }
  0x12   : > { %s726_s21 = scalar_select %p569_p11, 1, 0 }
  0x13   : > { %s727_s22 = scalar_select %p573_p12, 1, 0 }
  0x14   : > { %s313_s24 = sshll.u32 %s499_s12, 7  ;;  %s312_s25 = sshll.u32 %s578_s23, 3 }
  0x15   : > { %s587_s28 = scalar_lea.hbm %s719_s0, %s313_s24  ;;  %s121_s29 = scalar_lea.vmem [#allocation2], %s312_s25 }
  0x16   : > { %s128_s30 = sshll.u32 %s121_s29, 4  ;;  %p593_p13 = pnand %p341_p10, %p558_p5  ;;  %s597_s30 = int_to_ptr.vmem [resolvable:$true] %s128_s30 }
  0x17   : > { %s118_s4 = scalar_lea.sflag [#allocation3], %s578_s23  ;;  %s375_s5 = scalar_lea.hbm %s587_s28, 128 }
  0x18   : > { %p376_p2 = scmp.ne.s32.totalorder %s587_s28, %s375_s5  ;;  %p377_p3 = pneg %p593_p13 }
  0x19   : > { %s380_s8 = scalar_lea.hbm %s719_s0, 256  ;;  %p381_p5 = scmp.lt.s32.totalorder %s587_s28, %s719_s0 }
  0x1a   : > { %p378_p4 = pnand %p377_p3, %p376_p2  ;;  %p382_p8 = scmp.lt.s32.totalorder %s380_s8, %s375_s5 }
  0x1c   : > { %p379_p7 = pneg %p378_p4  ;;  %p383_p10 = por %p382_p8, %p381_p5 }
  0x1e   : > { %p384_p9 = pnand %p383_p10, %p379_p7 }
  0x20   : > { %387 = shalt.err (!%p384_p9)
}
  0x21   : > { %s388_s17 = scalar_lea.vmem %s597_s30, 128  ;;  %s501_s19 = smov [#allocation2]  }
  0x22   : > { %p389_p0 = scmp.ne.s32.totalorder %s597_s30, %s388_s17  ;;  %s393_s26 = sshll.u32 %s501_s19, 4  ;;  %s394_s26 = int_to_ptr.vmem [resolvable:$false] %s393_s26 }
  0x23   : > { %s395_s27 = scalar_lea.vmem %s394_s26, 256  ;;  %p396_p1 = scmp.lt.s32.totalorder %s597_s30, %s394_s26 }
  0x24   : > { %p391_p2 = pnand %p389_p0, %p377_p3  ;;  %p397_p12 = scmp.lt.s32.totalorder %s395_s27, %s388_s17 }
  0x26   : > { %p392_p4 = pneg %p391_p2  ;;  %p398_p11 = por %p397_p12, %p396_p1 }
  0x28   : > { %p399_p5 = pnand %p398_p11, %p392_p4 }
  0x2a   : > { %402 = shalt.err (!%p399_p5)
}
  0x2b   : > { %333 = dma.hbm_to_vmem [thread:$0]  (!%p593_p13), %s587_s28, 128, %s597_s30, %s118_s4  }
  0x2c   : > { %p729_p9 = scmp.lt.s32.totalorder %s499_s12, 3  ;;  %p730_p0 = scmp.ge.s32.totalorder %s499_s12, 1 }
  0x2d   : > { %s639_s7 = scalar_lea.hbm %s720_s1, %s313_s24  ;;  %s139_s8 = scalar_lea.vmem [#allocation5], %s312_s25 }
  0x2e   : > { %p630_p7 = pnand %p730_p0, %p729_p9  ;;  %s146_s14 = sshll.u32 %s139_s8, 4  ;;  %s147_s14 = int_to_ptr.vmem [resolvable:$true] %s146_s14 }
  0x2f   : > { %s136_s28 = scalar_lea.sflag [#allocation6], %s578_s23  ;;  %s403_s30 = scalar_lea.hbm %s639_s7, 128 }
  0x30   : > { %s731_s29 = scalar_select %p630_p7, 1, 0 }
  0x31   : > { %p404_p11 = scmp.ne.s32.totalorder %s639_s7, %s403_s30  ;;  %s408_s17 = scalar_lea.hbm %s720_s1, 256 }
  0x32   : > { %p409_p8 = scmp.lt.s32.totalorder %s639_s7, %s720_s1  ;;  %p410_p10 = scmp.lt.s32.totalorder %s408_s17, %s403_s30 }
  0x33   : > { %p406_p12 = pnand %p404_p11, %p377_p3 }
  0x34   : > { %p411_p2 = por %p410_p10, %p409_p8 }
  0x35   : > { %p407_p1 = pneg %p406_p12 }
  0x37   : > { %p412_p4 = pnand %p411_p2, %p407_p1 }
  0x39   : > { %415 = shalt.err (!%p412_p4)
}
  0x3a   : > { %s416_s25 = scalar_lea.vmem %s147_s14, 128  ;;  %s502_s23 = smov [#allocation5]  }
  0x3b   : > { %p417_p5 = scmp.ne.s32.totalorder %s147_s14, %s416_s25  ;;  %s421_s26 = sshll.u32 %s502_s23, 4  ;;  %s422_s26 = int_to_ptr.vmem [resolvable:$false] %s421_s26 }
  0x3c   : > { %s423_s27 = scalar_lea.vmem %s422_s26, 256  ;;  %p424_p11 = scmp.lt.s32.totalorder %s147_s14, %s422_s26 }
  0x3d   : > { %p419_p9 = pnand %p417_p5, %p377_p3  ;;  %p425_p12 = scmp.lt.s32.totalorder %s423_s27, %s416_s25 }
  0x3f   : > { %p420_p0 = pneg %p419_p9  ;;  %p426_p6 = por %p425_p12, %p424_p11 }
  0x41   : > { %p427_p7 = pnand %p426_p6, %p420_p0 }
  0x43   : > { %430 = shalt.err (!%p427_p7)
}
  0x44   : > { %336 = dma.hbm_to_vmem [thread:$0]  (!%p593_p13), %s639_s7, 128, %s147_s14, %s136_s28  }
  0x45   : > { %p732_p1 = scmp.ne.s32.totalorder %s731_s29, 0 }
  0x46   : > { %s665_s5 = sand.u32 (!%p732_p1), 1, %s491_s10   ;;  %p733_p3 = scmp.ne.s32.totalorder (!%p732_p1), %s725_s20, 0 }
  0x47   : > { %155 = sbr.rel (%p732_p1) target bundleno = 104 (0x68), region = 28  ;;  %s317_s6 = sshll.u32 (!%p732_p1), %s665_s5, 3 }
  0x48   : > { %s158_s8 = scalar_lea.sflag (!%p732_p1), [#allocation3], %s665_s5  ;;  %s161_s30 = scalar_lea.vmem (!%p732_p1), [#allocation2], %s317_s6 }
  0x4c   : > { %474 = dma.done.wait (%p733_p3), %s158_s8, 128  }
  0x4d   : > { %476 = vsyncadd (%p733_p3), %s158_s8, 4294967168  ;;  %s167_s3 = scalar_lea.sflag [#allocation6], %s665_s5  ;;  %s170_s7 = scalar_lea.vmem [#allocation5], %s317_s6 }
  0x4e   : > { %478 = dma.done.wait (%p733_p3), %s167_s3, 128  }
  0x4f   : > { %480 = vsyncadd (%p733_p3), %s167_s3, 4294967168  ;;  %s195_s29 = scalar_lea.vmem [#allocation7], %s317_s6  ;;  %s321_s28 = sshll.u32 %s540_s13, 7  ;;  %v196_v0 = vld [vmem:[%s161_s30] sm:$0xff]  ;;  %v198_v1 = vld [vmem:[%s170_s7] sm:$0xff] }
  0x50   : > { %s216_s14 = sshll.u32 %s195_s29, 4  ;;  %vm197_vm0 = vcmp.ge.f32.partialorder %v196_v0, 0.0  ;;  %v199_v2 = vmul.f32 %v198_v1, %v196_v0  ;;  %s214_s20 = scalar_lea.hbm %s721_s2, %s321_s28  ;;  %s679_s14 = int_to_ptr.vmem [resolvable:$true] %s216_s14 }
  0x51   : > { %s203_s17 = scalar_lea.sflag [#allocation4], %s665_s5  ;;  %s431_s24 = scalar_lea.vmem %s679_s14, 128 }
  0x52   : > { %v200_v3 = vsel %vm197_vm0, %v196_v0, %v199_v2  ;;  %p432_p6 = scmp.ne.s32.totalorder %s679_s14, %s431_s24  ;;  %p734_p13 = scmp.ne.s32.totalorder %s726_s21, 0 }
  0x53   : > { %201 = vst [vmem:[%s195_s29] sm:$0xff] %v200_v3  ;;  %s503_s13 = smov [#allocation7]  }
  0x54   : > { %p433_p7 = pnand %p432_p6, %p734_p13  ;;  %s435_s19 = sshll.u32 %s503_s13, 4  ;;  %s436_s19 = int_to_ptr.vmem [resolvable:$false] %s435_s19 }
  0x55   : > { %s437_s25 = scalar_lea.vmem %s436_s19, 256  ;;  %p438_p10 = scmp.lt.s32.totalorder %s679_s14, %s436_s19 }
  0x56   : > { %p434_p8 = pneg %p433_p7  ;;  %p439_p2 = scmp.lt.s32.totalorder %s437_s25, %s431_s24 }
  0x58   : > { %p440_p4 = por %p439_p2, %p438_p10 }
  0x5a   : > { %p441_p5 = pnand %p440_p4, %p434_p8 }
  0x5c   : > { %444 = shalt.err (!%p441_p5)
}
  0x5d   : > { %s445_s23 = scalar_lea.hbm %s214_s20, 128  ;;  %s449_s5 = scalar_lea.hbm %s721_s2, 256 }
  0x5e   : > { %p446_p9 = scmp.ne.s32.totalorder %s214_s20, %s445_s23  ;;  %p450_p12 = scmp.lt.s32.totalorder %s214_s20, %s721_s2 }
  0x5f   : > { %p451_p1 = scmp.lt.s32.totalorder %s449_s5, %s445_s23 }
  0x60   : > { %p447_p0 = pnand %p446_p9, %p734_p13 }
  0x61   : > { %p452_p3 = por %p451_p1, %p450_p12 }
  0x62   : > { %p448_p11 = pneg %p447_p0 }
  0x64   : > { %p453_p6 = pnand %p452_p3, %p448_p11 }
  0x66   : > { %456 = shalt.err (!%p453_p6)
}
  0x67   : > { %328 = dma.vmem_to_hbm [thread:$0]  (%p734_p13), %s679_s14, 128, %s214_s20, %s203_s17  }
  0x68 PF: > { %s228_s30 = sand.u32 1, %s487_s9   ;;  %p735_p7 = scmp.ne.s32.totalorder %s727_s22, 0 }
  0x69   : > { %p736_p8 = scmp.ge.s32.totalorder %s499_s12, 2  ;;  %s229_s3 = scalar_lea.sflag [#allocation4], %s228_s30 }
  0x6b   : > { %p338_p10 = pnand %p736_p8, %p735_p7 }
  0x6d   : > { %p339_p2 = pneg %p338_p10 }
  0x6f   : > { %482 = dma.done.wait (%p339_p2), %s229_s3, 128  }
  0x70   : > { %484 = vsyncadd (%p339_p2), %s229_s3, 4294967168  ;;  %p18_p4 = scmp.ge.s32.totalorder %s544_s15, 4   ;;  %s737_s9 = smov %s491_s10 }
  0x71   : > { %s738_s10 = smov %s495_s11  ;;  %s739_s11 = smov %s556_s18 }
  0x72   : > { %s740_s12 = smov %s544_s15  ;;  %20 = sbr.rel (!%p18_p4) target bundleno = 7 (0x7), region = 86 }
  0x77   :  { %234 = vsyncpa [#allocation3], 1 }
  0x78   :  { %236 = vsyncpa [#allocation3 + $0x1], 1 }
  0x79   :  { %237 = vsyncpa [#allocation6], 1 }
  0x7a   :  { %239 = vsyncpa [#allocation6 + $0x1], 1 }
  0x7b   :  { %240 = vsyncpa [#allocation4], 1 }
  0x7c   :  { %242 = vsyncpa [#allocation4 + $0x1], 1 }

</bundles_post_ra>
